<compile_context>
chip_gen: v7x
topology: tpu7x:2x2x1
jax: 0.10.0
libtpu: 0.0.40
codegen_flags: <defaults>
</compile_context>

<pallas_src>
import functools

import jax
import jax.numpy as jnp
from jax import lax
from jax.experimental import pallas as pl
from jax.experimental.pallas import tpu as pltpu


def _pick_f_tile(F):
    """Largest lane-dense tile that divides F (keeps per-step VMEM tiny on all chips)."""
    for t in (2048, 1024, 512, 256, 128):
        if F % t == 0:
            return t
    return F  # awkward / tiny F: single full block (still legal per BlockSpec rules)


def _feature_transfer_kernel(seed_ref, x_ref, w_ref, b_ref, o_ref, *, f_tile, training):
    # x_ref: (B, F_tile)   w_ref: (Dout, B)   b_ref: (Dout, 1)   o_ref: (Dout, F_tile)
    y = jnp.dot(w_ref[...], x_ref[...], preferred_element_type=jnp.float32)  # (Dout, F_tile)
    y = jnp.tanh(y + b_ref[...])

    if training:
        # Dropout(p=0.5): keep w.p. 0.5, rescale kept values by 2.0.
        # Deterministic hash of (seed, global element index) -> fair coin.
        dout, ft = y.shape
        row = lax.broadcasted_iota(jnp.int32, (dout, ft), 0).astype(jnp.uint32)
        col = lax.broadcasted_iota(jnp.int32, (dout, ft), 1).astype(jnp.uint32)
        col_g = col + (pl.program_id(0) * f_tile).astype(jnp.uint32)  # global F index
        seed_u32 = seed_ref[0].astype(jnp.uint32)

        z = seed_u32 + row * jnp.uint32(0x9E3779B1) + col_g * jnp.uint32(0x85EBCA77)
        # murmur3 fmix32 finalizer (all ops are plain uint32 VPU ops).
        z = z ^ (z >> 16)
        z = z * jnp.uint32(0x85EBCA6B)
        z = z ^ (z >> 13)
        z = z * jnp.uint32(0xC2B2AE35)
        z = z ^ (z >> 16)
        keep = (z & jnp.uint32(1)).astype(jnp.bool_)
        y = jnp.where(keep, y * jnp.float32(2.0), jnp.float32(0.0))

    o_ref[...] = y.astype(o_ref.dtype)


def feature_transfer(x, weight, bias, *, seed=0, training=True):
    """x: (B, C, H, W) f32. weight: (Dout, B) f32. bias: (Dout,) f32. Returns (F, Dout)."""
    B = x.shape[0]
    Dout, in_dim = weight.shape
    assert in_dim == B, "Module contract: Linear.in_features must equal batch size"

    x_flat = x.reshape(B, -1)            # (B, F)  -- F stays in the lane axis
    F_cols = x_flat.shape[1]
    f_tile = _pick_f_tile(F_cols)
    grid = (F_cols // f_tile,)

    b2 = bias.reshape(Dout, 1)           # bias varies along Dout (sublane axis)
    seed_arr = jnp.array([seed], dtype=jnp.int32)

    kernel = functools.partial(_feature_transfer_kernel, f_tile=f_tile, training=training)

    out_t = pl.pallas_call(
        kernel,
        out_shape=jax.ShapeDtypeStruct((Dout, F_cols), jnp.float32),
        grid_spec=pltpu.PrefetchScalarGridSpec(
            num_scalar_prefetch=1,       # seed -> SMEM
            grid=grid,
            in_specs=[
                pl.BlockSpec((B, f_tile), lambda i, s: (0, i)),     # x tile along F
                pl.BlockSpec((Dout, B), lambda i, s: (0, 0)),       # weight (resident)
                pl.BlockSpec((Dout, 1), lambda i, s: (0, 0)),       # bias   (resident)
            ],
            out_specs=pl.BlockSpec((Dout, f_tile), lambda i, s: (0, i)),
        ),
        compiler_params=pltpu.CompilerParams(
            dimension_semantics=("parallel",)),   # shards F across TCs on v7x
    )(seed_arr, x_flat, weight, b2)

    # Module contract: output shape (F, Dout). Single transpose at the very end.
    return jnp.transpose(out_t, (1, 0))


if __name__ == "__main__":
    # Shapes consistent with the module: Linear.in_features must equal batch B.
    B, C, H, W = 4, 2, 16, 16            # input_dim = B = 4, F = C*H*W = 512
    input_dim, output_dim = B, 8

    key = jax.random.PRNGKey(0)
    kx, kw, kb = jax.random.split(key, 3)

    x = jax.random.normal(kx, (B, C, H, W), dtype=jnp.float32)

    # Deterministic nn.Linear-style init: U(-1/sqrt(in), 1/sqrt(in)).
    bound = 1.0 / (input_dim ** 0.5)
    weight = jax.random.uniform(kw, (output_dim, input_dim),
                                minval=-bound, maxval=bound, dtype=jnp.float32)
    bias = jax.random.uniform(kb, (output_dim,),
                              minval=-bound, maxval=bound, dtype=jnp.float32)

    # --- correctness check with dropout disabled (eval-mode equivalent) ---
    out_eval = feature_transfer(x, weight, bias, training=False)
    out_eval = jax.block_until_ready(out_eval)
    ref = jnp.tanh(x.reshape(B, -1).T @ weight.T + bias)
    assert out_eval.shape == (C * H * W, output_dim)
    assert jnp.allclose(out_eval, ref, atol=1e-5, rtol=1e-5)

    # --- full forward (training=True -> dropout active) ---
    out_train = feature_transfer(x, weight, bias, seed=123, training=True)
    out_train = jax.block_until_ready(out_train)
    assert out_train.shape == (C * H * W, output_dim)

    # Kept entries equal 2x the eval output; keep-rate is roughly 1/2.
    kept = out_train != 0.0
    assert jnp.allclose(jnp.where(kept, out_train, 0.0),
                        jnp.where(kept, 2.0 * out_eval, 0.0), atol=1e-5, rtol=1e-5)
    keep_frac = jnp.mean(kept.astype(jnp.float32))
    assert 0.25 < float(keep_frac) < 0.75

    print("KERNEL_OK")
</pallas_src>

<mosaic_0001>
module attributes {stable_mosaic.version = 11 : i64} {
  func.func @_feature_transfer_kernel(%arg0: i32, %arg1: memref<1xi32, #tpu.memory_space<smem>>, %arg2: memref<4x512xf32, #tpu.memory_space<vmem>>, %arg3: memref<8x4xf32, #tpu.memory_space<vmem>>, %arg4: memref<8x1xf32, #tpu.memory_space<vmem>>, %arg5: memref<8x512xf32, #tpu.memory_space<vmem>>) attributes {dimension_semantics = [#tpu.dimension_semantics<parallel>], iteration_bounds = array<i64: 1>, scalar_prefetch = 1 : i64, scratch_operands = 0 : i64, tpu.core_type = #tpu.core_type<tc>, window_params = [{transform_indices = @transform_0, window_bounds = array<i64: 4, 512>}, {pipeline_mode = #tpu.pipeline_mode<synchronous>, transform_indices = @transform_1, window_bounds = array<i64: 8, 4>}, {pipeline_mode = #tpu.pipeline_mode<synchronous>, transform_indices = @transform_2, window_bounds = array<i64: 8, 1>}, {transform_indices = @transform_3, window_bounds = array<i64: 8, 512>}]} {
    %c0 = arith.constant 0 : index
    %c0_0 = arith.constant 0 : index
    %0 = vector.load %arg3[%c0, %c0_0] : memref<8x4xf32, #tpu.memory_space<vmem>>, vector<8x4xf32>
    %c0_1 = arith.constant 0 : index
    %c0_2 = arith.constant 0 : index
    %1 = vector.load %arg2[%c0_1, %c0_2] : memref<4x512xf32, #tpu.memory_space<vmem>>, vector<4x512xf32>
    %cst = arith.constant dense<0.000000e+00> : vector<8x512xf32>
    %2 = tpu.matmul %0, %1, %cst {dimension_numbers = #tpu.dot_dimension_numbers<[1], [0], [0], [1], [0, 0, 1, 1], [], []>} : vector<8x4xf32>, vector<4x512xf32>, vector<8x512xf32> -> vector<8x512xf32>
    %c0_3 = arith.constant 0 : index
    %c0_4 = arith.constant 0 : index
    %3 = vector.load %arg4[%c0_3, %c0_4] : memref<8x1xf32, #tpu.memory_space<vmem>>, vector<8x1xf32>
    %4 = vector.broadcast %3 : vector<8x1xf32> to vector<8x512xf32>
    %5 = arith.addf %2, %4 : vector<8x512xf32>
    %6 = math.tanh %5 : vector<8x512xf32>
    %c0_5 = arith.constant 0 : index
    %c0_6 = arith.constant 0 : index
    %7 = vector.load %arg5[%c0_5, %c0_6] : memref<8x512xf32, #tpu.memory_space<vmem>>, vector<8x512xf32>
    tpu.vector_store %arg5[%c0_5, %c0_6], %6 {strides = array<i32>} : memref<8x512xf32, #tpu.memory_space<vmem>>, vector<8x512xf32>,
    return
  }
  func.func @transform_0(%arg0: i32, %arg1: memref<1xi32, #tpu.memory_space<smem>>) -> (i32, i32) {
    %c0_i32 = arith.constant 0 : i32
    %c0_i32_0 = arith.constant 0 : i32
    return %c0_i32, %arg0 : i32, i32
  }
  func.func @transform_1(%arg0: i32, %arg1: memref<1xi32, #tpu.memory_space<smem>>) -> (i32, i32) {
    %c0_i32 = arith.constant 0 : i32
    %c0_i32_0 = arith.constant 0 : i32
    %c0_i32_1 = arith.constant 0 : i32
    return %c0_i32, %c0_i32_0 : i32, i32
  }
  func.func @transform_2(%arg0: i32, %arg1: memref<1xi32, #tpu.memory_space<smem>>) -> (i32, i32) {
    %c0_i32 = arith.constant 0 : i32
    %c0_i32_0 = arith.constant 0 : i32
    %c0_i32_1 = arith.constant 0 : i32
    return %c0_i32, %c0_i32_0 : i32, i32
  }
  func.func @transform_3(%arg0: i32, %arg1: memref<1xi32, #tpu.memory_space<smem>>) -> (i32, i32) {
    %c0_i32 = arith.constant 0 : i32
    %c0_i32_0 = arith.constant 0 : i32
    return %c0_i32, %arg0 : i32, i32
  }
}

</mosaic_0001>

<bundles_post_ra>
// kernel: tpu_custom_call.1
= control target key start
LH: loop header
LB: loop body
LE: loop exit
PB: predicated region body
PF: predicated region fallthrough
CT: control target
= control target key end

     0   :  { %vm34_vm0 = vcmask 1043456   ;;  %v251_v4 = vmov 0.0   ;;  %s307_s0 = inlined_call_operand.<no memory space> [shape: s32[1], index: 0, kind: input, shape index: {}]   ;;  %s308_s1 = inlined_call_operand.vmem [shape: f32[4,512], index: 1, kind: input, shape index: {}]   ;;  %s309_s2 = inlined_call_operand.vmem [shape: f32[8,4], index: 2, kind: input, shape index: {}]   ;;  %s310_s3 = inlined_call_operand.vmem [shape: f32[8,1], index: 3, kind: input, shape index: {}]   ;;  %s311_s4 = inlined_call_operand.hbm [shape: f32[8,512], index: 4, kind: output, shape index: {}]  }
   0x1   :  { %v18_v0 = vld [vmem:[%s308_s1] sm:$0xff]  ;;  %v19_v1 = vld [vmem:[%s308_s1 + $0x8] sm:$0xff]  ;;  %107 = vmatprep.mubr.f32.mxu0 %v251_v4  ;;  %178 = vmatprep.mubr.f32.mxu1 %v251_v4 }
   0x2   :  { %v28_v2 = vcombine.high %v18_v0, %v18_v0  ;;  %v29_v3 = vcombine.high %v19_v1, %v19_v1 }
   0x3   :  { %10 = vsyncpa [#allocation5], 0  ;;  %v17_v5 = vld [vmem:[%s309_s2] sm:$0xff]  ;;  %vm30_vm1 = vcmask 31744   ;;  %v252_v6 = vmov 0   ;;  %s253_s1 = smov [#allocation4]  }
   0x4   :  { %216 = vset.pattern.permute.xlu0 %v252_v6  ;;  %207 = vmatprep.subr.msk.mxu0 %vm34_vm0, %v28_v2  ;;  %v20_v7 = vld [vmem:[%s310_s3] sm:$0xff]  ;;  %s199_s2 = sshll.u32 %s253_s1, 4  ;;  %s200_s2 = int_to_ptr.vmem [resolvable:$true] %s199_s2 }
   0x5   :  { %210 = vmatprep.subr.msk.mxu1 %vm34_vm0, %v29_v3  ;;  %208 = vmatpush1.msk.msra.mxu0 %vm34_vm0, %v18_v0  ;;  %s227_s3 = scalar_lea.vmem %s200_s2, 512  ;;  %p232_p1 = scmp.lt.s32.totalorder %s200_s2, %s200_s2 }
   0x6   :  { %211 = vmatpush1.msk.msra.mxu1 %vm34_vm0, %v19_v1  ;;  %209 = vmatmul.mubr.msk.f32.vlgmr.msra.gmra.mrb[0].mxu0 %vm30_vm1, %v17_v5  ;;  %p228_p0 = scmp.ne.s32.totalorder %s200_s2, %s227_s3  ;;  %p233_p2 = scmp.lt.s32.totalorder %s227_s3, %s227_s3 }
   0x7   :  { %212 = vmatmul.mubr.msk.f32.vlgmr.msra.gmra.mrb[0].mxu1 %vm30_vm1, %v17_v5  ;;  %23 = vperm.xlu0 %216, %v20_v7  }
   0x8   :  { %p234_p3 = por %p233_p2, %p232_p1 }
   0xa   :  { %p235_p4 = pnand %p234_p3, %p228_p0 }
  0x86   :  { %v24_v8 = vpop.permute.xlu0 %23 }
  0xd9   :  { %v109_v9 = vpop.f32.mrb[0].mxu0 }
  0xda   :  { %v180_v10 = vpop.f32.mrb[0].mxu1  ;;  %v110_v11 = vadd.f32 %v109_v9, %v24_v8  ;;  %v111_v13 = vpop.f32.mrb[1].mxu0 }
  0xdb   :  { %v181_v12 = vadd.f32 %v180_v10, %v24_v8  ;;  %v182_v14 = vpop.f32.mrb[1].mxu1  ;;  %v112_v15 = vadd.f32 %v111_v13, %v24_v8 }
  0xdc   :  { %v183_v16 = vadd.f32 %v182_v14, %v24_v8  ;;  %219 = vtanh.f32 %v110_v11 }
  0xdd   :  { %221 = vtanh.f32 %v181_v12 }
  0xde   :  { %223 = vtanh.f32 %v112_v15 }
  0xdf   :  { %225 = vtanh.f32 %v183_v16 }
  0xe6   :  { %v220_v17 = vpop.eup %219 }
  0xe7   :  { %v222_v18 = vpop.eup %221  ;;  %189 = vst [vmem:[#allocation4] sm:$0xff] %v220_v17 }
  0xe8   :  { %v224_v19 = vpop.eup %223  ;;  %191 = vst [vmem:[#allocation4 + $0x10] sm:$0xff] %v222_v18 }
  0xe9   :  { %v226_v20 = vpop.eup %225  ;;  %190 = vst [vmem:[#allocation4 + $0x8] sm:$0xff] %v224_v19 }
  0xea   :  { %192 = vst [vmem:[#allocation4 + $0x18] sm:$0xff] %v226_v20 }
  0xeb   :  { %238 = shalt.err (!%p235_p4)
}
  0xec   :  { %s239_s24 = scalar_lea.hbm %s311_s4, 512 }
  0xed   :  { %p240_p5 = scmp.ne.s32.totalorder %s311_s4, %s239_s24  ;;  %p243_p6 = scmp.lt.u32.totalorder %s239_s24, %s311_s4 }
  0xef   :  { %p245_p7 = pnand %p243_p6, %p240_p5 }
  0xf1   :  { %248 = shalt.err (!%p245_p7)
}
  0xf2   :  { %202 = dma.vmem_to_hbm [thread:$0]  %s200_s2, 512, %s311_s4, [#allocation5]  }
  0xf3   :  { %249 = dma.done.wait [#allocation5], 512  }
  0xf4   :  { %250 = vsyncadd [#allocation5], 4294966784 }
  0xf5   :  { %206 = vsyncpa [#allocation5], 1 }

</bundles_post_ra>
